<compile_context>
chip_gen: v7x
topology: tpu7x:2x2x1
jax: 0.10.0
libtpu: 0.0.40
codegen_flags: <defaults>
</compile_context>

<pallas_src>
import functools

import jax
import jax.numpy as jnp
from jax import lax
from jax.experimental import pallas as pl
from jax.experimental.pallas import tpu as pltpu

LANE = 128


def _round_up(n: int, m: int) -> int:
    return pl.cdiv(n, m) * m


def _critic_kernel(s_ref, a_ref, w1s_ref, w1a_ref, b1_ref, w2_ref, b2_ref,
                   w3t_ref, b3_ref, o_ref):
    wdt = w1s_ref.dtype                       # MXU operand dtype (f32 or bf16)

    # Layer 1: relu(concat([s, a]) @ W1 + b1) as two dots (no concat needed).
    h1 = (jnp.dot(s_ref[...].astype(wdt), w1s_ref[...],
                  preferred_element_type=jnp.float32)
          + jnp.dot(a_ref[...].astype(wdt), w1a_ref[...],
                    preferred_element_type=jnp.float32)
          + b1_ref[...])
    h1 = jnp.maximum(h1, 0.0)

    # Layer 2: relu(h1 @ W2 + b2)   (fp32 accumulate / epilogue).
    h2 = jnp.dot(h1.astype(wdt), w2_ref[...],
                 preferred_element_type=jnp.float32) + b2_ref[...]
    h2 = jnp.maximum(h2, 0.0)

    # Layer 3: q = W3^T @ h2^T  -> (O, tb); lane-dense along the batch tile,
    # so the writeback is exactly O*tb floats (no 128-lane padding).
    q = lax.dot_general(w3t_ref[...], h2.astype(wdt),
                        dimension_numbers=(((1,), (1,)), ((), ())),
                        preferred_element_type=jnp.float32) + b3_ref[...]
    o_ref[...] = q.astype(o_ref.dtype)


def pack_params(params, state_dim, compute_dtype=jnp.bfloat16):
    """Split W1 by state/action rows, transpose W3, zero-pad the hidden dim to
    128 lanes, and cast MXU weight operands (biases stay fp32)."""
    w1, b1, w2, b2, w3, b3 = (params["w1"], params["b1"], params["w2"],
                              params["b2"], params["w3"], params["b3"])
    K, H = w1.shape
    O = w3.shape[1]
    Hp = _round_up(H, LANE)
    cd = compute_dtype

    w1s = jnp.zeros((state_dim, Hp), cd).at[:, :H].set(w1[:state_dim].astype(cd))
    w1a = jnp.zeros((K - state_dim, Hp), cd).at[:, :H].set(w1[state_dim:].astype(cd))
    w2p = jnp.zeros((Hp, Hp), cd).at[:H, :H].set(w2.astype(cd))
    w3t = jnp.zeros((O, Hp), cd).at[:, :H].set(w3.T.astype(cd))
    b1p = jnp.zeros((1, Hp), jnp.float32).at[:, :H].set(b1.astype(jnp.float32))
    b2p = jnp.zeros((1, Hp), jnp.float32).at[:, :H].set(b2.astype(jnp.float32))
    b3p = b3.astype(jnp.float32).reshape(O, 1)
    return {"w1s": w1s, "w1a": w1a, "b1": b1p, "w2": w2p, "b2": b2p,
            "w3t": w3t, "b3": b3p}


@functools.partial(jax.jit, static_argnames=("block_b",))
def ddpg_critic_forward(s, a, packed, *, block_b=1024):
    """Pallas forward for DDPGCritic.  s: (B, state_dim), a: (B, action_dim).
    Returns (B, output_size) fp32."""
    B, state_dim = s.shape
    action_dim = a.shape[1]
    O = packed["w3t"].shape[0]

    if B <= LANE:
        tb = B                                   # single full-extent block
    else:
        # Tile is a multiple of 128 (lane-dense output, packed sublanes for any
        # operand dtype); keep >= 2 grid steps when B allows so v7x's two
        # TensorCores both get work under dimension_semantics=("parallel",).
        tb = max(LANE, min(_round_up(block_b, LANE),
                           _round_up(pl.cdiv(B, 2), LANE)))
    grid = (pl.cdiv(B, tb),)

    def const(shape):                            # VMEM-resident weights/biases
        return pl.BlockSpec(shape, lambda i: (0, 0))

    out = pl.pallas_call(
        _critic_kernel,
        out_shape=jax.ShapeDtypeStruct((O, B), jnp.float32),
        grid=grid,
        in_specs=[
            pl.BlockSpec((tb, state_dim), lambda i: (i, 0)),   # batch-tiled s
            pl.BlockSpec((tb, action_dim), lambda i: (i, 0)),  # batch-tiled a
            const(packed["w1s"].shape),
            const(packed["w1a"].shape),
            const(packed["b1"].shape),
            const(packed["w2"].shape),
            const(packed["b2"].shape),
            const(packed["w3t"].shape),
            const(packed["b3"].shape),
        ],
        out_specs=pl.BlockSpec((O, tb), lambda i: (0, i)),     # lane-dense out
        compiler_params=pltpu.CompilerParams(
            dimension_semantics=("parallel",)),
    )(s, a, packed["w1s"], packed["w1a"], packed["b1"], packed["w2"],
      packed["b2"], packed["w3t"], packed["b3"])

    return out.T                                  # (B, O)


def init_params(key, input_size, hidden_size, output_size):
    """nn.Linear-style init (uniform +/- 1/sqrt(fan_in)); weights stored
    transposed as (in_features, out_features)."""
    ks = jax.random.split(key, 6)

    def lin(kw, kb, fan_in, fan_out):
        bound = 1.0 / jnp.sqrt(fan_in)
        w = jax.random.uniform(kw, (fan_in, fan_out), jnp.float32, -bound, bound)
        b = jax.random.uniform(kb, (fan_out,), jnp.float32, -bound, bound)
        return w, b

    w1, b1 = lin(ks[0], ks[1], input_size, hidden_size)
    w2, b2 = lin(ks[2], ks[3], hidden_size, hidden_size)
    w3, b3 = lin(ks[4], ks[5], hidden_size, output_size)
    return {"w1": w1, "b1": b1, "w2": w2, "b2": b2, "w3": w3, "b3": b3}


def reference_forward(s, a, params):
    hi = lax.Precision.HIGHEST
    x = jnp.concatenate([s, a], axis=1)
    x = jnp.maximum(jnp.dot(x, params["w1"], precision=hi) + params["b1"], 0.0)
    x = jnp.maximum(jnp.dot(x, params["w2"], precision=hi) + params["b2"], 0.0)
    return jnp.dot(x, params["w3"], precision=hi) + params["b3"]


if __name__ == "__main__":
    # DDPG critic shapes: state_dim=12, action_dim=4 -> input_size=16,
    # hidden_size=32, output_size=1.
    state_dim, action_dim = 12, 4
    input_size, hidden_size, output_size = state_dim + action_dim, 32, 1

    key = jax.random.PRNGKey(0)
    k_s, k_a, k_p, k_s2, k_a2 = jax.random.split(key, 5)
    params = init_params(k_p, input_size, hidden_size, output_size)

    # --- Case 1: tiny batch, fp32 operands, single full-extent block ---
    batch = 8
    s = jax.random.normal(k_s, (batch, state_dim), jnp.float32)
    a = jax.random.normal(k_a, (batch, action_dim), jnp.float32)
    packed_f32 = pack_params(params, state_dim, jnp.float32)
    out = jax.block_until_ready(ddpg_critic_forward(s, a, packed_f32))
    ref = reference_forward(s, a, params)
    assert out.shape == (batch, output_size), out.shape
    assert jnp.allclose(out, ref, atol=5e-3, rtol=5e-3)

    # --- Case 2: non-multiple batch -> 2-step grid with a partial last tile ---
    batch2 = 200
    s2 = jax.random.normal(k_s2, (batch2, state_dim), jnp.float32)
    a2 = jax.random.normal(k_a2, (batch2, action_dim), jnp.float32)
    out2 = jax.block_until_ready(ddpg_critic_forward(s2, a2, packed_f32))
    ref2 = reference_forward(s2, a2, params)
    assert out2.shape == (batch2, output_size), out2.shape
    assert jnp.allclose(out2, ref2, atol=5e-3, rtol=5e-3)

    # --- Case 3: default bf16 MXU-operand path, fp32 accumulate/epilogue ---
    packed_bf16 = pack_params(params, state_dim)          # bf16 by default
    out3 = jax.block_until_ready(ddpg_critic_forward(s2, a2, packed_bf16))
    assert out3.shape == (batch2, output_size), out3.shape
    assert jnp.allclose(out3, ref2, atol=5e-2, rtol=5e-2)

    # --- Case 4: larger batch, multi-step grid with explicit tile size ---
    batch3 = 1600
    s3 = jax.random.normal(jax.random.PRNGKey(1), (batch3, state_dim), jnp.float32)
    a3 = jax.random.normal(jax.random.PRNGKey(2), (batch3, action_dim), jnp.float32)
    out4 = jax.block_until_ready(ddpg_critic_forward(s3, a3, packed_f32, block_b=512))
    ref4 = reference_forward(s3, a3, params)
    assert out4.shape == (batch3, output_size), out4.shape
    assert jnp.allclose(out4, ref4, atol=5e-3, rtol=5e-3)

    print("KERNEL_OK")
</pallas_src>

<mosaic_0001>
module attributes {stable_mosaic.version = 11 : i64} {
  func.func @_critic_kernel(%arg0: i32, %arg1: memref<8x12xf32, #tpu.memory_space<vmem>>, %arg2: memref<8x4xf32, #tpu.memory_space<vmem>>, %arg3: memref<12x128xf32, #tpu.memory_space<vmem>>, %arg4: memref<4x128xf32, #tpu.memory_space<vmem>>, %arg5: memref<1x128xf32, #tpu.memory_space<vmem>>, %arg6: memref<128x128xf32, #tpu.memory_space<vmem>>, %arg7: memref<1x128xf32, #tpu.memory_space<vmem>>, %arg8: memref<1x128xf32, #tpu.memory_space<vmem>>, %arg9: memref<1x1xf32, #tpu.memory_space<vmem>>, %arg10: memref<1x8xf32, #tpu.memory_space<vmem>>) attributes {dimension_semantics = [#tpu.dimension_semantics<parallel>], iteration_bounds = array<i64: 1>, scalar_prefetch = 0 : i64, scratch_operands = 0 : i64, tpu.core_type = #tpu.core_type<tc>, window_params = [{transform_indices = @transform_0, window_bounds = array<i64: 8, 12>}, {transform_indices = @transform_1, window_bounds = array<i64: 8, 4>}, {pipeline_mode = #tpu.pipeline_mode<synchronous>, transform_indices = @transform_2, window_bounds = array<i64: 12, 128>}, {pipeline_mode = #tpu.pipeline_mode<synchronous>, transform_indices = @transform_3, window_bounds = array<i64: 4, 128>}, {pipeline_mode = #tpu.pipeline_mode<synchronous>, transform_indices = @transform_4, window_bounds = array<i64: 1, 128>}, {pipeline_mode = #tpu.pipeline_mode<synchronous>, transform_indices = @transform_5, window_bounds = array<i64: 128, 128>}, {pipeline_mode = #tpu.pipeline_mode<synchronous>, transform_indices = @transform_6, window_bounds = array<i64: 1, 128>}, {pipeline_mode = #tpu.pipeline_mode<synchronous>, transform_indices = @transform_7, window_bounds = array<i64: 1, 128>}, {pipeline_mode = #tpu.pipeline_mode<synchronous>, transform_indices = @transform_8, window_bounds = array<i64: 1, 1>}, {transform_indices = @transform_9, window_bounds = array<i64: 1, 8>}]} {
    %c0 = arith.constant 0 : index
    %c0_0 = arith.constant 0 : index
    %0 = vector.load %arg1[%c0, %c0_0] : memref<8x12xf32, #tpu.memory_space<vmem>>, vector<8x12xf32>
    %c0_1 = arith.constant 0 : index
    %c0_2 = arith.constant 0 : index
    %1 = vector.load %arg3[%c0_1, %c0_2] : memref<12x128xf32, #tpu.memory_space<vmem>>, vector<12x128xf32>
    %cst = arith.constant dense<0.000000e+00> : vector<8x128xf32>
    %2 = tpu.matmul %0, %1, %cst {dimension_numbers = #tpu.dot_dimension_numbers<[1], [0], [0], [1], [0, 0, 1, 1], [], []>} : vector<8x12xf32>, vector<12x128xf32>, vector<8x128xf32> -> vector<8x128xf32>
    %c0_3 = arith.constant 0 : index
    %c0_4 = arith.constant 0 : index
    %3 = vector.load %arg2[%c0_3, %c0_4] : memref<8x4xf32, #tpu.memory_space<vmem>>, vector<8x4xf32>
    %c0_5 = arith.constant 0 : index
    %c0_6 = arith.constant 0 : index
    %4 = vector.load %arg4[%c0_5, %c0_6] : memref<4x128xf32, #tpu.memory_space<vmem>>, vector<4x128xf32>
    %cst_7 = arith.constant dense<0.000000e+00> : vector<8x128xf32>
    %5 = tpu.matmul %3, %4, %cst_7 {dimension_numbers = #tpu.dot_dimension_numbers<[1], [0], [0], [1], [0, 0, 1, 1], [], []>} : vector<8x4xf32>, vector<4x128xf32>, vector<8x128xf32> -> vector<8x128xf32>
    %6 = arith.addf %2, %5 : vector<8x128xf32>
    %c0_8 = arith.constant 0 : index
    %c0_9 = arith.constant 0 : index
    %7 = vector.load %arg5[%c0_8, %c0_9] : memref<1x128xf32, #tpu.memory_space<vmem>>, vector<1x128xf32>
    %8 = vector.broadcast %7 : vector<1x128xf32> to vector<8x128xf32>
    %9 = arith.addf %6, %8 : vector<8x128xf32>
    %cst_10 = arith.constant 0.000000e+00 : f32
    %10 = vector.broadcast %cst_10 : f32 to vector<8x128xf32>
    %11 = arith.maximumf %9, %10 : vector<8x128xf32>
    %c0_11 = arith.constant 0 : index
    %c0_12 = arith.constant 0 : index
    %12 = vector.load %arg6[%c0_11, %c0_12] : memref<128x128xf32, #tpu.memory_space<vmem>>, vector<128x128xf32>
    %cst_13 = arith.constant dense<0.000000e+00> : vector<8x128xf32>
    %13 = tpu.matmul %11, %12, %cst_13 {dimension_numbers = #tpu.dot_dimension_numbers<[1], [0], [0], [1], [0, 0, 1, 1], [], []>} : vector<8x128xf32>, vector<128x128xf32>, vector<8x128xf32> -> vector<8x128xf32>
    %c0_14 = arith.constant 0 : index
    %c0_15 = arith.constant 0 : index
    %14 = vector.load %arg7[%c0_14, %c0_15] : memref<1x128xf32, #tpu.memory_space<vmem>>, vector<1x128xf32>
    %15 = vector.broadcast %14 : vector<1x128xf32> to vector<8x128xf32>
    %16 = arith.addf %13, %15 : vector<8x128xf32>
    %cst_16 = arith.constant 0.000000e+00 : f32
    %17 = vector.broadcast %cst_16 : f32 to vector<8x128xf32>
    %18 = arith.maximumf %16, %17 : vector<8x128xf32>
    %c0_17 = arith.constant 0 : index
    %c0_18 = arith.constant 0 : index
    %19 = vector.load %arg8[%c0_17, %c0_18] : memref<1x128xf32, #tpu.memory_space<vmem>>, vector<1x128xf32>
    %cst_19 = arith.constant dense<0.000000e+00> : vector<1x8xf32>
    %20 = tpu.matmul %19, %18, %cst_19 {dimension_numbers = #tpu.dot_dimension_numbers<[1], [1], [0], [0], [0, 0, 1, 0], [], []>} : vector<1x128xf32>, vector<8x128xf32>, vector<1x8xf32> -> vector<1x8xf32>
    %c0_20 = arith.constant 0 : index
    %c0_21 = arith.constant 0 : index
    %21 = vector.load %arg9[%c0_20, %c0_21] : memref<1x1xf32, #tpu.memory_space<vmem>>, vector<1x1xf32>
    %22 = vector.broadcast %21 : vector<1x1xf32> to vector<1x8xf32>
    %23 = arith.addf %20, %22 : vector<1x8xf32>
    %c0_22 = arith.constant 0 : index
    %c0_23 = arith.constant 0 : index
    %24 = vector.load %arg10[%c0_22, %c0_23] : memref<1x8xf32, #tpu.memory_space<vmem>>, vector<1x8xf32>
    tpu.vector_store %arg10[%c0_22, %c0_23], %23 {strides = array<i32>} : memref<1x8xf32, #tpu.memory_space<vmem>>, vector<1x8xf32>,
    return
  }
  func.func @transform_0(%arg0: i32) -> (i32, i32) {
    %c0_i32 = arith.constant 0 : i32
    %c0_i32_0 = arith.constant 0 : i32
    return %arg0, %c0_i32 : i32, i32
  }
  func.func @transform_1(%arg0: i32) -> (i32, i32) {
    %c0_i32 = arith.constant 0 : i32
    %c0_i32_0 = arith.constant 0 : i32
    return %arg0, %c0_i32 : i32, i32
  }
  func.func @transform_2(%arg0: i32) -> (i32, i32) {
    %c0_i32 = arith.constant 0 : i32
    %c0_i32_0 = arith.constant 0 : i32
    %c0_i32_1 = arith.constant 0 : i32
    return %c0_i32, %c0_i32_0 : i32, i32
  }
  func.func @transform_3(%arg0: i32) -> (i32, i32) {
    %c0_i32 = arith.constant 0 : i32
    %c0_i32_0 = arith.constant 0 : i32
    %c0_i32_1 = arith.constant 0 : i32
    return %c0_i32, %c0_i32_0 : i32, i32
  }
  func.func @transform_4(%arg0: i32) -> (i32, i32) {
    %c0_i32 = arith.constant 0 : i32
    %c0_i32_0 = arith.constant 0 : i32
    %c0_i32_1 = arith.constant 0 : i32
    return %c0_i32, %c0_i32_0 : i32, i32
  }
  func.func @transform_5(%arg0: i32) -> (i32, i32) {
    %c0_i32 = arith.constant 0 : i32
    %c0_i32_0 = arith.constant 0 : i32
    %c0_i32_1 = arith.constant 0 : i32
    return %c0_i32, %c0_i32_0 : i32, i32
  }
  func.func @transform_6(%arg0: i32) -> (i32, i32) {
    %c0_i32 = arith.constant 0 : i32
    %c0_i32_0 = arith.constant 0 : i32
    %c0_i32_1 = arith.constant 0 : i32
    return %c0_i32, %c0_i32_0 : i32, i32
  }
  func.func @transform_7(%arg0: i32) -> (i32, i32) {
    %c0_i32 = arith.constant 0 : i32
    %c0_i32_0 = arith.constant 0 : i32
    %c0_i32_1 = arith.constant 0 : i32
    return %c0_i32, %c0_i32_0 : i32, i32
  }
  func.func @transform_8(%arg0: i32) -> (i32, i32) {
    %c0_i32 = arith.constant 0 : i32
    %c0_i32_0 = arith.constant 0 : i32
    %c0_i32_1 = arith.constant 0 : i32
    return %c0_i32, %c0_i32_0 : i32, i32
  }
  func.func @transform_9(%arg0: i32) -> (i32, i32) {
    %c0_i32 = arith.constant 0 : i32
    %c0_i32_0 = arith.constant 0 : i32
    return %c0_i32, %arg0 : i32, i32
  }
}

</mosaic_0001>

<bundles_post_ra>
// kernel: ddpg_critic_forward.1
= control target key start
LH: loop header
LB: loop body
LE: loop exit
PB: predicated region body
PF: predicated region fallthrough
CT: control target
= control target key end

     0   :  { %s692_s0 = inlined_call_operand.vmem [shape: f32[8,12], index: 0, kind: input, shape index: {}]   ;;  %s693_s1 = inlined_call_operand.vmem [shape: f32[8,4], index: 1, kind: input, shape index: {}]   ;;  %s694_s2 = inlined_call_operand.vmem [shape: f32[12,128], index: 2, kind: input, shape index: {}]   ;;  %s695_s3 = inlined_call_operand.vmem [shape: f32[4,128], index: 3, kind: input, shape index: {}]   ;;  %s696_s4 = inlined_call_operand.vmem [shape: f32[1,128], index: 4, kind: input, shape index: {}]   ;;  %s697_s5 = inlined_call_operand.hbm [shape: f32[128,128], index: 5, kind: input, shape index: {}]   ;;  %s698_s6 = inlined_call_operand.vmem [shape: f32[1,128], index: 6, kind: input, shape index: {}]   ;;  %s699_s7 = inlined_call_operand.vmem [shape: f32[1,128], index: 7, kind: input, shape index: {}]   ;;  %s700_s8 = inlined_call_operand.<no memory space> [shape: f32[1,1], index: 8, kind: input, shape index: {}]   ;;  %s701_s9 = inlined_call_operand.hbm [shape: f32[1,8], index: 9, kind: output, shape index: {}]  }
   0x1   :  { %v14_v0 = vstv %s700_s8 }
   0x2   :  { %15 = vst [vmem:[#allocation2] sm:$0x1] %v14_v0 }
   0x3   :  { %16 = vsyncpa [#allocation4], 0 }
   0x4   :  { %17 = vsyncpa [#allocation5], 0  ;;  %s578_s11 = smov [#allocation3]   ;;  %s530_s15 = scalar_lea.hbm %s697_s5, 2048 }
   0x5   :  { %s33_s12 = sshll.u32 %s578_s11, 4  ;;  %p531_p0 = scmp.ne.s32.totalorder %s697_s5, %s530_s15  ;;  %s34_s12 = int_to_ptr.vmem [resolvable:$true] %s33_s12 }
   0x6   :  { %p534_p1 = scmp.lt.u32.totalorder %s530_s15, %s697_s5 }
   0x8   :  { %p536_p2 = pnand %p534_p1, %p531_p0 }
   0xa   :  { %539 = shalt.err (!%p536_p2)
}
   0xb   :  { %s540_s8 = scalar_lea.vmem %s34_s12, 2048  ;;  %p545_p4 = scmp.lt.s32.totalorder %s34_s12, %s34_s12 }
   0xc   :  { %p541_p3 = scmp.ne.s32.totalorder %s34_s12, %s540_s8  ;;  %p546_p5 = scmp.lt.s32.totalorder %s540_s8, %s540_s8 }
   0xe   :  { %p547_p6 = por %p546_p5, %p545_p4 }
  0x10   :  { %p548_p7 = pnand %p547_p6, %p541_p3 }
  0x12   :  { %551 = shalt.err (!%p548_p7)
}
  0x13   :  { %s579_s20 = smov 128   ;;  %s580_s21 = smov 8  }
  0x14   :  { %39 = dma.hbm_to_vmem [thread:$0]  %s697_s5, 2048, %s34_s12, [#allocation4], %s579_s20, %s579_s20, %s580_s21  }
  0x15   :  { %574 = dma.done.wait [#allocation4], 2048  }
  0x16   :  { %575 = vsyncadd [#allocation4], 4294965248  ;;  %v581_v1 = vmov 0.0   ;;  %vm582_vm0 = vmmov 0   ;;  %v583_v2 = vmov 0.0|0.0   ;;  %vm58_vm1 = vcmask 1043456  }
  0x17   :  { %440 = vmatprep.subr.mxu1 %v581_v1  ;;  %442 = vmatprep.mubr.msk.f32.mxu1 %vm582_vm0, %v581_v1  ;;  %vm54_vm2 = vcmask 31744   ;;  %v53_v3 = vld [vmem:[%s695_s3] sm:$0xf]  ;;  %vm584_vm3 = vmmov 1   ;;  %v51_v6 = vld [vmem:[%s694_s2 + $0x8] sm:$0xf]  ;;  %v319_v49 = vlaneseq }
  0x18   :  { %496 = vmatprep.subr.bf16.mxu0 %v583_v2  ;;  %484 = vmatprep.mubr.msk.f32.mxu0 %vm582_vm0, %v581_v1  ;;  %v52_v4 = vld [vmem:[%s693_s1] sm:$0xff]  ;;  %vm494_vm4 = vmpackc.low %vm58_vm1, %vm584_vm3  ;;  %v219_v9 = vld [vmem:[#allocation3 + $0x8] sm:$0xff]  ;;  %vm132_vm5 = vcmask 97280   ;;  %v585_v42 = vmov 0   ;;  %s586_s13 = smov [#allocation6]   ;;  %vm393_vm6 = vcmask 57344  }
  0x19   :  { %v50_v5 = vld [vmem:[%s694_s2] sm:$0xff]  ;;  %441 = vmatpush3.msk.msra.mxu1 %vm58_vm1, %v53_v3  ;;  %v220_v10 = vld [vmem:[#allocation3 + $0x10] sm:$0xff]  ;;  %v223_v16 = vld [vmem:[#allocation3 + $0x28] sm:$0xff]  ;;  %529 = vset.pattern.permute.xlu0 %v585_v42  ;;  %v320_v50 = vshrl.u32 %v319_v49, 7  ;;  %s401_s14 = sshll.u32 %s586_s13, 4  ;;  %s402_s14 = int_to_ptr.vmem [resolvable:$true] %s401_s14 }
  0x1a   :  { %v218_v7 = vld [vmem:[#allocation3] sm:$0xff]  ;;  %443 = vmatmul.mubr.msk.f32.vlgmr.msra.gmra.mrb[0].mxu1 %vm54_vm2, %v52_v4  ;;  %492 = vmatprep.subr.bf16.mxu1 %v583_v2  ;;  %v493_v8 = vpack.c.bf16 %v51_v6, %v50_v5  ;;  %v221_v11 = vld [vmem:[#allocation3 + $0x18] sm:$0xff]  ;;  %v224_v18 = vld [vmem:[#allocation3 + $0x30] sm:$0xff]  ;;  %s556_s15 = scalar_lea.vmem %s402_s14, 32  ;;  %p557_p9 = scmp.lt.s32.totalorder %s402_s14, %s402_s14 }
  0x1b   :  { %449 = vmatprep.mubr.msk.f32.mxu1 %vm582_vm0, %v581_v1  ;;  %v497_v12 = vpack.c.bf16 %v219_v9, %v218_v7  ;;  %v49_v13 = vld [vmem:[%s692_s0] sm:$0xff]  ;;  %v500_v14 = vpack.c.bf16 %v221_v11, %v220_v10  ;;  %v227_v22 = vld [vmem:[#allocation3 + $0x48] sm:$0xff]  ;;  %v228_v24 = vld [vmem:[#allocation3 + $0x50] sm:$0xff]  ;;  %v321_v51 = vsub.s32 0, %v320_v50 }
  0x1c   :  { %495 = vmatpush3.bf16.msk.msra.mxu1 %vm494_vm4, %v493_v8  ;;  %v222_v15 = vld [vmem:[#allocation3 + $0x20] sm:$0xff]  ;;  %v225_v19 = vld [vmem:[#allocation3 + $0x38] sm:$0xff]  ;;  %v231_v28 = vld [vmem:[#allocation3 + $0x68] sm:$0xff] }
  0x1d   :  { %498 = vmatpush3.bf16.msra.mxu0 %v497_v12  ;;  %487 = vmatprep.subr.mxu1 %v581_v1  ;;  %v503_v17 = vpack.c.bf16 %v223_v16, %v222_v15  ;;  %v506_v20 = vpack.c.bf16 %v225_v19, %v224_v18  ;;  %v226_v21 = vld [vmem:[#allocation3 + $0x40] sm:$0xff]  ;;  %v229_v25 = vld [vmem:[#allocation3 + $0x58] sm:$0xff]  ;;  %v232_v30 = vld [vmem:[#allocation3 + $0x70] sm:$0xff] }
  0x1e   :  { %499 = vmatprep.subr.bf16.mxu0 %v583_v2  ;;  %v509_v23 = vpack.c.bf16 %v227_v22, %v226_v21  ;;  %v512_v26 = vpack.c.bf16 %v229_v25, %v228_v24  ;;  %v230_v27 = vld [vmem:[#allocation3 + $0x60] sm:$0xff]  ;;  %v233_v31 = vld [vmem:[#allocation3 + $0x78] sm:$0xff] }
  0x1f   :  { %450 = vmatmul.mubr.msk.f32.vlgmr.msra.gmra.mrb[2].mxu1 %vm132_vm5, %v49_v13  ;;  %v515_v29 = vpack.c.bf16 %v231_v28, %v230_v27  ;;  %v518_v32 = vpack.c.bf16 %v233_v31, %v232_v30  ;;  %v414_v36 = vld [vmem:[%s696_s4] ss:$0 sm:$0xff] }
  0x20   :  { %489 = vmatprep.mubr.msk.f32.mxu1 %vm582_vm0, %v581_v1  ;;  %v313_v41 = vld [vmem:[#allocation2] sm:$0x1] }
  0x21   :  { %501 = vmatpush3.bf16.msra.mxu0 %v500_v14  ;;  %316 = vperm.xlu0 %529, %v313_v41   ;;  %v415_v43 = vld [vmem:[%s698_s6] ss:$0 sm:$0xff]  ;;  %s552_s6 = scalar_lea.vmem %s402_s14, 16 }
  0x22   :  { %502 = vmatprep.subr.bf16.mxu0 %v583_v2  ;;  %v312_v48 = vld [vmem:[%s699_s7] sm:$0x1]  ;;  %p553_p8 = scmp.ne.s32.totalorder %s402_s14, %s552_s6  ;;  %p558_p10 = scmp.lt.s32.totalorder %s556_s15, %s552_s6 }
  0x24   :  { %p559_p11 = por %p558_p10, %p557_p9 }
  0x25   :  { %504 = vmatpush3.bf16.msra.mxu0 %v503_v17 }
  0x26   :  { %505 = vmatprep.subr.bf16.mxu0 %v583_v2  ;;  %p560_p12 = pnand %p559_p11, %p553_p8 }
  0x29   :  { %507 = vmatpush3.bf16.msra.mxu0 %v506_v20 }
  0x2a   :  { %508 = vmatprep.subr.bf16.mxu0 %v583_v2 }
  0x2d   :  { %510 = vmatpush3.bf16.msra.mxu0 %v509_v23 }
  0x2e   :  { %511 = vmatprep.subr.bf16.mxu0 %v583_v2 }
  0x31   :  { %513 = vmatpush3.bf16.msra.mxu0 %v512_v26 }
  0x32   :  { %514 = vmatprep.subr.bf16.mxu0 %v583_v2 }
  0x35   :  { %516 = vmatpush3.bf16.msra.mxu0 %v515_v29 }
  0x36   :  { %517 = vmatprep.subr.bf16.mxu0 %v583_v2 }
  0x39   :  { %519 = vmatpush3.bf16.msra.mxu0 %v518_v32 }
  0xa0   :  { %v317_v52 = vpop.permute.xlu0 %316 }
  0xa1   :  { %v322_v53 = vrot.slane %v317_v52, %v321_v51 }
  0xed   :  { %v128_v33 = vpop.f32.mrb[0].mxu1 }
  0xee   :  { %v444_v34 = vpop.f32.mrb[1].mxu1 }
  0xf2   :  { %v205_v35 = vpop.f32.mrb[2].mxu1 }
  0xf3   :  { %v206_v37 = vadd.f32 %v205_v35, %v128_v33  ;;  %v451_v38 = vpop.f32.mrb[3].mxu1 }
  0xf5   :  { %v216_v39 = vadd.f32 %v414_v36, %v206_v37 }
  0xf7   :  { %v217_v40 = vmax.f32 %v216_v39, 0.0 }
  0xf9   :  { %485 = vmatmul.mubr.f32.vlgmr.msra.gmra.mrb[0].mxu0 %v217_v40 }
 0x1cc   :  { %v307_v44 = vpop.f32.mrb[0].mxu0 }
 0x1cd   :  { %v308_v45 = vadd.f32 %v415_v43, %v307_v44  ;;  %v486_v46 = vpop.f32.mrb[1].mxu0 }
 0x1cf   :  { %v311_v47 = vmax.f32 %v308_v45, 0.0 }
 0x1d1   :  { %488 = vmatpush3.xpose.msra.mxu1 %v311_v47 }
 0x1d4   :  { %490 = vmatmul.mubr.f32.vlgmr.msra.gmra.mrb[4].mxu1 %v312_v48 }
 0x2a7   :  { %v389_v54 = vpop.f32.mrb[4].mxu1 }
 0x2a8   :  { %v390_v55 = vadd.f32 %v389_v54, %v322_v53  ;;  %v491_v56 = vpop.f32.mrb[5].mxu1 }
 0x2aa   :  { %394 = vst.msk [vmem:[#allocation6] sm:$0x1] %vm393_vm6, %v390_v55 }
 0x2ab   :  { %563 = shalt.err (!%p560_p12)
}
 0x2ac   :  { %s564_s17 = scalar_lea.hbm %s701_s9, 16 }
 0x2ad   :  { %p565_p13 = scmp.ne.s32.totalorder %s701_s9, %s564_s17  ;;  %p568_p0 = scmp.lt.u32.totalorder %s564_s17, %s701_s9 }
 0x2af   :  { %p570_p1 = pnand %p568_p0, %p565_p13 }
 0x2b1   :  { %573 = shalt.err (!%p570_p1)
}
 0x2b2   :  { %404 = dma.vmem_to_hbm [thread:$0]  %s402_s14, 16, %s701_s9, [#allocation5]  }
 0x2b3   :  { %576 = dma.done.wait [#allocation5], 16  }
 0x2b4   :  { %577 = vsyncadd [#allocation5], 4294967280 }
 0x2b5   :  { %408 = vsyncpa [#allocation4], 1 }
 0x2b6   :  { %409 = vsyncpa [#allocation5], 1 }

</bundles_post_ra>
